<compile_context>
chip_gen: v5e
topology: v5e:2x2
jax: 0.10.0
libtpu: 0.0.40
codegen_flags: <defaults>
</compile_context>

<pallas_src>
import functools

import jax
import jax.numpy as jnp
from jax import lax
from jax.experimental import pallas as pl
from jax.experimental.pallas import tpu as pltpu


# ------------------------------ tiling helpers -------------------------------

_VMEM_BUDGET = 24 * 1024 * 1024        # sizing budget (headroom under limit)
_VMEM_LIMIT = 32 * 1024 * 1024         # explicit scoped-VMEM limit (all gens)


def _pick_tile(dim, target, align):
    """Largest `align`-multiple tile <= target that divides dim, else dim."""
    if dim <= target:
        return dim
    t = (target // align) * align
    while t >= align:
        if dim % t == 0:
            return t
        t -= align
    return dim


def _sublane_align(itemsize):
    # 8 for f32, 16 for bf16, 32 for int8/fp8
    return max(8, 32 // int(itemsize))


def _proj_tiles(M, N, K, itemsize):
    sub = _sublane_align(itemsize)
    tm = _pick_tile(M, 512, sub)
    tn = _pick_tile(N, 512, 128)
    tk = K if K <= 2048 else _pick_tile(K, 1024, 128)

    def need(tm_, tn_, tk_):
        # double-buffered x / w / out blocks + f32 accumulator
        return 2 * itemsize * (tm_ * tk_ + tk_ * tn_ + tm_ * tn_) + 4 * tm_ * tn_

    while need(tm, tn, tk) > _VMEM_BUDGET and tk >= 256 and K % (tk // 2) == 0:
        tk //= 2
    while need(tm, tn, tk) > _VMEM_BUDGET and tm >= 2 * sub and M % (tm // 2) == 0:
        tm //= 2
    return tm, tn, tk


def _attn_tiles(S, H, n_head, head_dim, itemsize):
    sub = _sublane_align(itemsize)
    lane_pad = lambda n: ((max(n, 1) + 127) // 128) * 128
    tq = _pick_tile(S, 512, sub)

    def need(tq_, tkv_):
        io = 2 * itemsize * lane_pad(H) * (2 * tq_ + 2 * tkv_)   # q,o + k,v (2x buffered)
        sc = 4 * n_head * tq_ * (2 * lane_pad(1) + lane_pad(head_dim))
        return io + sc

    # Prefer full-S K/V residency (no re-streaming per q tile); shrink if needed.
    tkv = S if need(tq, S) <= _VMEM_BUDGET else _pick_tile(S, 1024, 128)
    while need(tq, tkv) > _VMEM_BUDGET and tkv >= 256 and S % (tkv // 2) == 0:
        tkv //= 2
    while need(tq, tkv) > _VMEM_BUDGET and tq >= 2 * sub and S % (tq // 2) == 0:
        tq //= 2
    return tq, tkv


# ------------------------------ Pallas kernels ------------------------------

def _qkv_proj_kernel(x_ref, w_ref, o_ref, acc_ref, *, q_scale):
    # grid = (M/tm, H/tn, 3, D/tk); x:(tm,tk)  w:(1,tk,tn)  o:(1,tm,tn)
    @pl.when(pl.program_id(3) == 0)
    def _():
        acc_ref[...] = jnp.zeros_like(acc_ref)

    acc_ref[...] += jnp.dot(x_ref[...], w_ref[0],
                            preferred_element_type=jnp.float32)

    last_k = pl.program_id(3) == pl.num_programs(3) - 1
    is_q = pl.program_id(2) == 0

    # 1/sqrt(head_dim) folded into the q plane at finalize (free vs. rescaling
    # q on every kv step inside attention).
    @pl.when(last_k & is_q)
    def _():
        o_ref[0] = (acc_ref[...] * q_scale).astype(o_ref.dtype)

    @pl.when(last_k & jnp.logical_not(is_q))
    def _():
        o_ref[0] = acc_ref[...].astype(o_ref.dtype)


def _linear_bias_kernel(x_ref, w_ref, b_ref, o_ref, acc_ref):
    # grid = (M/tm, N/tn, K/tk); bias is added only on the last k step.
    @pl.when(pl.program_id(2) == 0)
    def _():
        acc_ref[...] = jnp.zeros_like(acc_ref)

    acc_ref[...] += jnp.dot(x_ref[...], w_ref[...],
                            preferred_element_type=jnp.float32)

    @pl.when(pl.program_id(2) == pl.num_programs(2) - 1)
    def _():
        o_ref[...] = (acc_ref[...] + b_ref[...]).astype(o_ref.dtype)


def _flash_attention_kernel(q_ref, k_ref, v_ref, o_ref, m_ref, l_ref, acc_ref,
                            *, n_head, head_dim, exp_bf16, approx_recip):
    # grid = (B, S/tq, S/tkv); kv axis innermost ("arbitrary" reduction).
    # q:(1,1,tq,H)  k/v:(1,1,tkv,H)  o:(1,tq,H), H = n_head*head_dim.
    # The 1/sqrt(hd) scale is already baked into q by the projection kernel.
    ki = pl.program_id(2)

    @pl.when(ki == 0)
    def _():
        m_ref[...] = jnp.full(m_ref.shape, -jnp.inf, jnp.float32)
        l_ref[...] = jnp.zeros_like(l_ref)
        acc_ref[...] = jnp.zeros_like(acc_ref)

    q = q_ref[0, 0]          # (tq, H)   lane-dense loads
    k = k_ref[0, 0]          # (tkv, H)
    v = v_ref[0, 0]          # (tkv, H)

    # Online softmax per head; the head loop is unrolled (static lane slices),
    # which avoids any HBM / in-kernel head transpose.
    # TODO(synk): for n_head >= 8-16 chunk this loop (lax.fori_loop unroll) if
    # bundle dumps show vreg spills.
    for h in range(n_head):
        lo = h * head_dim
        qh = q[:, lo:lo + head_dim]                        # (tq,  hd)
        kh = k[:, lo:lo + head_dim]                        # (tkv, hd)
        vh = v[:, lo:lo + head_dim]                        # (tkv, hd)

        # scores = q_h @ k_h^T  (contract hd, no transpose copy)
        s = lax.dot_general(qh, kh, (((1,), (1,)), ((), ())),
                            preferred_element_type=jnp.float32)   # (tq, tkv)

        m_prev = m_ref[h]                                  # (tq, 1)
        l_prev = l_ref[h]
        m_new = jnp.maximum(m_prev, jnp.max(s, axis=-1, keepdims=True))
        alpha = jnp.exp(m_prev - m_new)                    # (tq, 1) f32

        z = s - m_new
        if exp_bf16:
            # bf16 EUP exp path (values <= 1); feeds the MXU without a recast.
            z = z.astype(jnp.bfloat16)
        p = jnp.exp(z)                                     # (tq, tkv)

        m_ref[h] = m_new
        l_ref[h] = alpha * l_prev + jnp.sum(p, axis=-1, keepdims=True,
                                            dtype=jnp.float32)
        acc_ref[h] = alpha * acc_ref[h] + lax.dot_general(
            p.astype(v.dtype), vh, (((1,), (0,)), ((), ())),
            preferred_element_type=jnp.float32)            # (tq, hd)

    @pl.when(ki == pl.num_programs(2) - 1)
    def _():
        # Normalize and store each head's chunk directly (no concat temp);
        # output stays in the merged (tq, H) layout so no transpose is needed
        # before the output projection.
        for h in range(n_head):
            lo = h * head_dim
            inv = pl.reciprocal(l_ref[h], approx=approx_recip)   # (tq, 1)
            o_ref[0, :, lo:lo + head_dim] = (acc_ref[h] * inv).astype(o_ref.dtype)


# -------------------------------- wrappers ----------------------------------

def _qkv_projection(x2d, w3, head_dim):
    # x2d: (M, D); w3: (3, D, H)  ->  (3, M, H)   (planes: q*scale, k, v)
    M, D = x2d.shape
    _, _, H = w3.shape
    itemsize = jnp.dtype(x2d.dtype).itemsize
    tm, tn, tk = _proj_tiles(M, H, D, itemsize)
    grid = (M // tm, H // tn, 3, D // tk)
    q_scale = 1.0 / float(head_dim) ** 0.5
    return pl.pallas_call(
        functools.partial(_qkv_proj_kernel, q_scale=q_scale),
        out_shape=jax.ShapeDtypeStruct((3, M, H), x2d.dtype),
        grid=grid,
        in_specs=[
            pl.BlockSpec((tm, tk), lambda i, j, s, kk: (i, kk)),
            pl.BlockSpec((1, tk, tn), lambda i, j, s, kk: (s, kk, j)),
        ],
        out_specs=pl.BlockSpec((1, tm, tn), lambda i, j, s, kk: (s, i, j)),
        scratch_shapes=[pltpu.VMEM((tm, tn), jnp.float32)],
        compiler_params=pltpu.CompilerParams(
            dimension_semantics=("parallel", "parallel", "arbitrary",
                                 "arbitrary"),
            vmem_limit_bytes=_VMEM_LIMIT),
    )(x2d, w3)


def _linear_bias(x2d, w, b):
    # (M, K) @ (K, N) + b  ->  (M, N)
    M, K = x2d.shape
    _, N = w.shape
    itemsize = jnp.dtype(x2d.dtype).itemsize
    tm, tn, tk = _proj_tiles(M, N, K, itemsize)
    grid = (M // tm, N // tn, K // tk)
    return pl.pallas_call(
        _linear_bias_kernel,
        out_shape=jax.ShapeDtypeStruct((M, N), x2d.dtype),
        grid=grid,
        in_specs=[
            pl.BlockSpec((tm, tk), lambda i, j, k: (i, k)),
            pl.BlockSpec((tk, tn), lambda i, j, k: (k, j)),
            pl.BlockSpec((1, tn), lambda i, j, k: (0, j)),
        ],
        out_specs=pl.BlockSpec((tm, tn), lambda i, j, k: (i, j)),
        scratch_shapes=[pltpu.VMEM((tm, tn), jnp.float32)],
        compiler_params=pltpu.CompilerParams(
            dimension_semantics=("parallel", "parallel", "arbitrary"),
            vmem_limit_bytes=_VMEM_LIMIT),
    )(x2d, w, b.reshape(1, N))


def _flash_attention(qkv3, n_head, head_dim):
    # qkv3: (3, B, S, H) with H = n_head * head_dim  ->  (B, S, H)
    _, B, S, H = qkv3.shape
    itemsize = jnp.dtype(qkv3.dtype).itemsize
    tq, tkv = _attn_tiles(S, H, n_head, head_dim, itemsize)
    grid = (B, S // tq, S // tkv)

    exp_bf16 = qkv3.dtype == jnp.bfloat16          # bf16 EUP exp on bf16 runs
    approx_recip = qkv3.dtype != jnp.float32       # exact reciprocal for f32

    q_spec = pl.BlockSpec((1, 1, tq, H), lambda b, qi, ki: (0, b, qi, 0))
    k_spec = pl.BlockSpec((1, 1, tkv, H), lambda b, qi, ki: (1, b, ki, 0))
    v_spec = pl.BlockSpec((1, 1, tkv, H), lambda b, qi, ki: (2, b, ki, 0))

    return pl.pallas_call(
        functools.partial(_flash_attention_kernel, n_head=n_head,
                          head_dim=head_dim, exp_bf16=exp_bf16,
                          approx_recip=approx_recip),
        out_shape=jax.ShapeDtypeStruct((B, S, H), qkv3.dtype),
        grid=grid,
        in_specs=[q_spec, k_spec, v_spec],
        out_specs=pl.BlockSpec((1, tq, H), lambda b, qi, ki: (b, qi, 0)),
        scratch_shapes=[
            pltpu.VMEM((n_head, tq, 1), jnp.float32),          # running max
            pltpu.VMEM((n_head, tq, 1), jnp.float32),          # running denom
            pltpu.VMEM((n_head, tq, head_dim), jnp.float32),   # out accumulator
        ],
        compiler_params=pltpu.CompilerParams(
            dimension_semantics=("parallel", "parallel", "arbitrary"),
            vmem_limit_bytes=_VMEM_LIMIT),
    )(qkv3, qkv3, qkv3)


def multi_head_self_attention(x, params, n_head, head_size):
    """Pallas forward pass matching MultiHeadSelfAttention.forward (eval, no mask)."""
    B, S, D = x.shape
    hd = head_size // n_head

    w3 = params["w_qkv3"]      # (3, D, H)   planes: q, k, v weights
    w_proj = params["w_proj"]  # (H, D)      == torch proj.weight.T
    b_proj = params["b_proj"]  # (D,)

    # QKV projection emits q/k/v as planes of (3, B*S, H); the q plane already
    # carries the 1/sqrt(hd) softmax scale. (qkv_network has bias=False in the
    # PyTorch module, so no bias here.)
    qkv = _qkv_projection(x.reshape(B * S, D), w3, hd)        # (3, B*S, H)
    qkv = qkv.reshape(3, B, S, head_size)                     # free reshape

    # Flash attention over all heads of a batch per grid step; output comes
    # back already merged as (B, S, H) -> no transpose before the projection.
    attn = _flash_attention(qkv, n_head, hd)                  # (B, S, H)

    # Output projection (+bias); resid_dropout is identity in eval.
    out = _linear_bias(attn.reshape(B * S, head_size), w_proj, b_proj)
    return out.reshape(B, S, D)


# --------------------------- reference (plain JAX) ---------------------------

def _reference(x, w_qkv, w_proj, b_proj, n_head, head_size):
    # Mirrors the torch forward with a (D, 3H) qkv weight (== weight.T).
    B, S, D = x.shape
    hd = head_size // n_head
    qkv = x @ w_qkv
    q, k, v = jnp.split(qkv, 3, axis=2)
    qh = q.reshape(B, S, n_head, hd).transpose(0, 2, 1, 3)
    kh = k.reshape(B, S, n_head, hd).transpose(0, 2, 1, 3)
    vh = v.reshape(B, S, n_head, hd).transpose(0, 2, 1, 3)
    att = jnp.einsum("bhqd,bhkd->bhqk", qh, kh) / jnp.sqrt(jnp.float32(hd))
    att = jax.nn.softmax(att, axis=-1)
    out = jnp.einsum("bhqk,bhkd->bhqd", att, vh)
    out = out.transpose(0, 2, 1, 3).reshape(B, S, head_size)
    return out @ w_proj + b_proj


# ----------------------------------- main ------------------------------------

if __name__ == "__main__":
    # small shapes consistent with the module's forward
    batch = 2
    seq = 8
    instance_size = 32   # D
    n_head = 4
    head_size = 32       # H (multi_head_size = 8)
    # p_dropout = 0.0 -> dropout is identity

    key = jax.random.PRNGKey(0)
    k_x, k_qkv, k_proj, k_bias = jax.random.split(key, 4)

    x = jax.random.normal(k_x, (batch, seq, instance_size), dtype=jnp.float32)

    # torch-equivalent weights: w_qkv is (in, 3H) == qkv_network.weight.T
    w_qkv = 0.1 * jax.random.normal(
        k_qkv, (instance_size, 3 * head_size), dtype=jnp.float32)
    w_proj = 0.1 * jax.random.normal(
        k_proj, (head_size, instance_size), dtype=jnp.float32)
    b_proj = 0.1 * jax.random.normal(
        k_bias, (instance_size,), dtype=jnp.float32)

    # One-time checkpoint-conversion layout (NOT a per-forward transpose):
    # plane s of w_qkv3 == w_qkv[:, s*H:(s+1)*H].
    w_qkv3 = w_qkv.reshape(instance_size, 3, head_size).transpose(1, 0, 2)

    params = {"w_qkv3": w_qkv3, "w_proj": w_proj, "b_proj": b_proj}

    out = multi_head_self_attention(x, params, n_head, head_size)
    out = jax.block_until_ready(out)

    ref = _reference(x, w_qkv, w_proj, b_proj, n_head, head_size)
    assert out.shape == (batch, seq, instance_size)
    assert jnp.allclose(out, ref, atol=2e-3, rtol=2e-3), "mismatch vs reference"

    print("KERNEL_OK")
</pallas_src>

<mosaic_0001>
module attributes {stable_mosaic.version = 11 : i64} {
  func.func @_qkv_proj_kernel(%arg0: i32, %arg1: i32, %arg2: i32, %arg3: i32, %arg4: memref<16x32xf32, #tpu.memory_space<vmem>>, %arg5: memref<1x32x32xf32, #tpu.memory_space<vmem>>, %arg6: memref<1x16x32xf32, #tpu.memory_space<vmem>>, %arg7: memref<16x32xf32, #tpu.memory_space<vmem>>) attributes {dimension_semantics = [#tpu.dimension_semantics<parallel>, #tpu.dimension_semantics<parallel>, #tpu.dimension_semantics<arbitrary>, #tpu.dimension_semantics<arbitrary>], iteration_bounds = array<i64: 1, 1, 3, 1>, scalar_prefetch = 0 : i64, scratch_operands = 1 : i64, tpu.core_type = #tpu.core_type<tc>, window_params = [{transform_indices = @transform_0, window_bounds = array<i64: 16, 32>}, {transform_indices = @transform_1, window_bounds = array<i64: 1, 32, 32>}, {transform_indices = @transform_2, window_bounds = array<i64: 1, 16, 32>}]} {
    %c0_i32 = arith.constant 0 : i32
    %0 = arith.cmpi eq, %arg3, %c0_i32 : i32
    %1 = arith.extui %0 : i1 to i32
    %c0_i32_0 = arith.constant 0 : i32
    %2 = arith.cmpi ne, %1, %c0_i32_0 : i32
    scf.if %2 {
      %cst_13 = arith.constant 0.000000e+00 : f32
      %19 = vector.broadcast %cst_13 : f32 to vector<16x32xf32>
      %c0_14 = arith.constant 0 : index
      %c0_15 = arith.constant 0 : index
      %20 = vector.load %arg7[%c0_14, %c0_15] : memref<16x32xf32, #tpu.memory_space<vmem>>, vector<16x32xf32>
      tpu.vector_store %arg7[%c0_14, %c0_15], %19 {strides = array<i32>} : memref<16x32xf32, #tpu.memory_space<vmem>>, vector<16x32xf32>,
    } else {
    }
    %c0 = arith.constant 0 : index
    %c0_1 = arith.constant 0 : index
    %3 = vector.load %arg7[%c0, %c0_1] : memref<16x32xf32, #tpu.memory_space<vmem>>, vector<16x32xf32>
    %c0_2 = arith.constant 0 : index
    %c0_3 = arith.constant 0 : index
    %4 = vector.load %arg4[%c0_2, %c0_3] : memref<16x32xf32, #tpu.memory_space<vmem>>, vector<16x32xf32>
    %c0_4 = arith.constant 0 : index
    %c0_5 = arith.constant 0 : index
    %c0_6 = arith.constant 0 : index
    %5 = vector.load %arg5[%c0_4, %c0_5, %c0_6] : memref<1x32x32xf32, #tpu.memory_space<vmem>>, vector<1x32x32xf32>
    %6 = vector.shape_cast %5 : vector<1x32x32xf32> to vector<32x32xf32>
    %cst = arith.constant dense<0.000000e+00> : vector<16x32xf32>
    %7 = tpu.matmul %4, %6, %cst {dimension_numbers = #tpu.dot_dimension_numbers<[1], [0], [0], [1], [0, 0, 1, 1], [], []>} : vector<16x32xf32>, vector<32x32xf32>, vector<16x32xf32> -> vector<16x32xf32>
    %8 = arith.addf %3, %7 : vector<16x32xf32>
    %c0_7 = arith.constant 0 : index
    %c0_8 = arith.constant 0 : index
    %9 = vector.load %arg7[%c0_7, %c0_8] : memref<16x32xf32, #tpu.memory_space<vmem>>, vector<16x32xf32>
    tpu.vector_store %arg7[%c0_7, %c0_8], %8 {strides = array<i32>} : memref<16x32xf32, #tpu.memory_space<vmem>>, vector<16x32xf32>,
    %c0_i32_9 = arith.constant 0 : i32
    %10 = arith.cmpi eq, %arg3, %c0_i32_9 : i32
    %c0_i32_10 = arith.constant 0 : i32
    %11 = arith.cmpi eq, %arg2, %c0_i32_10 : i32
    %12 = arith.andi %10, %11 : i1
    %13 = arith.extui %12 : i1 to i32
    %c0_i32_11 = arith.constant 0 : i32
    %14 = arith.cmpi ne, %13, %c0_i32_11 : i32
    scf.if %14 {
      %c0_13 = arith.constant 0 : index
      %c0_14 = arith.constant 0 : index
      %19 = vector.load %arg7[%c0_13, %c0_14] : memref<16x32xf32, #tpu.memory_space<vmem>>, vector<16x32xf32>
      %cst_15 = arith.constant 0.353553385 : f32
      %20 = vector.broadcast %cst_15 : f32 to vector<16x32xf32>
      %21 = arith.mulf %19, %20 : vector<16x32xf32>
      %c0_16 = arith.constant 0 : index
      %c0_17 = arith.constant 0 : index
      %c0_18 = arith.constant 0 : index
      %22 = vector.load %arg6[%c0_16, %c0_17, %c0_18] : memref<1x16x32xf32, #tpu.memory_space<vmem>>, vector<1x16x32xf32>
      %23 = vector.shape_cast %22 : vector<1x16x32xf32> to vector<16x32xf32>
      %24 = vector.shape_cast %21 : vector<16x32xf32> to vector<1x16x32xf32>
      tpu.vector_store %arg6[%c0_16, %c0_17, %c0_18], %24 {strides = array<i32>} : memref<1x16x32xf32, #tpu.memory_space<vmem>>, vector<1x16x32xf32>,
    } else {
    }
    %true = arith.constant true
    %15 = arith.xori %11, %true : i1
    %16 = arith.andi %10, %15 : i1
    %17 = arith.extui %16 : i1 to i32
    %c0_i32_12 = arith.constant 0 : i32
    %18 = arith.cmpi ne, %17, %c0_i32_12 : i32
    scf.if %18 {
      %c0_13 = arith.constant 0 : index
      %c0_14 = arith.constant 0 : index
      %19 = vector.load %arg7[%c0_13, %c0_14] : memref<16x32xf32, #tpu.memory_space<vmem>>, vector<16x32xf32>
      %c0_15 = arith.constant 0 : index
      %c0_16 = arith.constant 0 : index
      %c0_17 = arith.constant 0 : index
      %20 = vector.load %arg6[%c0_15, %c0_16, %c0_17] : memref<1x16x32xf32, #tpu.memory_space<vmem>>, vector<1x16x32xf32>
      %21 = vector.shape_cast %20 : vector<1x16x32xf32> to vector<16x32xf32>
      %22 = vector.shape_cast %19 : vector<16x32xf32> to vector<1x16x32xf32>
      tpu.vector_store %arg6[%c0_15, %c0_16, %c0_17], %22 {strides = array<i32>} : memref<1x16x32xf32, #tpu.memory_space<vmem>>, vector<1x16x32xf32>,
    } else {
    }
    return
  }
  func.func @transform_0(%arg0: i32, %arg1: i32, %arg2: i32, %arg3: i32) -> (i32, i32) {
    %c0_i32 = arith.constant 0 : i32
    return %arg0, %arg3 : i32, i32
  }
  func.func @transform_1(%arg0: i32, %arg1: i32, %arg2: i32, %arg3: i32) -> (i32, i32, i32) {
    %c0_i32 = arith.constant 0 : i32
    return %arg2, %arg3, %arg1 : i32, i32, i32
  }
  func.func @transform_2(%arg0: i32, %arg1: i32, %arg2: i32, %arg3: i32) -> (i32, i32, i32) {
    %c0_i32 = arith.constant 0 : i32
    return %arg2, %arg0, %arg1 : i32, i32, i32
  }
}

</mosaic_0001>

<bundles_post_ra>
// kernel: tpu_custom_call.1
= control target key start
LH: loop header
LB: loop body
LE: loop exit
PB: predicated region body
PF: predicated region fallthrough
CT: control target
= control target key end

     0   :  { %7 = vsyncpa [#allocation4], 0  ;;  %s873_s0 = inlined_call_operand.hbm [shape: f32[16,32], index: 0, kind: input, shape index: {}]   ;;  %s874_s1 = inlined_call_operand.hbm [shape: f32[3,32,32], index: 1, kind: input, shape index: {}]   ;;  %s875_s2 = inlined_call_operand.hbm [shape: f32[3,16,32], index: 2, kind: output, shape index: {}]  }
   0x1   :  { %8 = vsyncpa [#allocation7], 0 }
   0x2   :  { %10 = vsyncpa [#allocation7 + $0x1], 0 }
   0x3   :  { %11 = vsyncpa [#allocation5], 0 }
   0x4   :  { %13 = vsyncpa [#allocation5 + $0x1], 0  ;;  %s707_s9 = smov 0   ;;  %s709_s10 = smov 0  }
   0x5   :  { %s711_s11 = smov 0   ;;  %s713_s12 = smov 0  }
   0x6   :  { %s715_s13 = smov 0   ;;  %s717_s14 = smov 0  }
   0x7 LB: > { %s431_s15 = sadd.s32 4294967295, %s684_s14   ;;  %s432_s16 = sadd.s32 4294967294, %s684_s14   ;;  %s684_s14 = sphi %s717_s14, %s19_s14   ;;  %s680_s13 = sphi %s715_s13, %s887_s13   ;;  %s676_s12 = sphi %s713_s12, %s886_s12   ;;  %s672_s11 = sphi %s711_s11, %s885_s11   ;;  %s668_s10 = sphi %s709_s10, %s884_s10   ;;  %s664_s9 = sphi %s707_s9, %s883_s9  }
   0x8   : > { %p97_p0 = scmp.ne.s32.totalorder %s668_s10, %s664_s9  ;;  %p741_p1 = scmp.eq.s32.totalorder %s431_s15, 0 }
   0x9   : > { %p745_p2 = scmp.eq.s32.totalorder %s431_s15, 2  ;;  %p131_p3 = scmp.eq.s32.totalorder %s432_s16, 2 }
   0xa   : > { %p751_p4 = por %p741_p1, %p97_p0  ;;  %p433_p5 = scmp.ge.s32.totalorder %s684_s14, 1 }
   0xb   : > { %p756_p6 = por %p131_p3, %p97_p0  ;;  %p138_p7 = scmp.lt.s32.totalorder %s684_s14, 4 }
   0xc   : > { %s153_s23 = sshll.u32 %s873_s0, 4  ;;  %s686_s25 = smov [#allocation3]   ;;  %s154_s23 = int_to_ptr.hbm [resolvable:$true] %s153_s23 }
   0xd   : > { %p764_p8 = pnand %p433_p5, %p138_p7  ;;  %s155_s26 = sshll.u32 %s686_s25, 4  ;;  %s156_s26 = int_to_ptr.vmem [resolvable:$true] %s155_s26 }
   0xe   : > { %s687_s27 = smov 128   ;;  %s688_s28 = smov 8  }
   0xf   : > { %p468_p9 = pneg %p764_p8  ;;  %s37_s29 = sadd.s32 1, %s680_s13 }
  0x10   : > { %p39_p11 = scmp.ge.s32.totalorder %s37_s29, 3  ;;  %s84_s30 = sadd.s32 1, %s672_s11 }
  0x11   : > { %p469_p10 = pnand %p468_p9, %p741_p1  ;;  %p91_p12 = scmp.ne.s32.totalorder %s672_s11, %s668_s10 }
  0x12   : > { %p92_p13 = scmp.eq.s32.totalorder %s684_s14, 0  ;;  %s889_s29 = smov (%p39_p11, %s37_s29), 0 }
  0x13   : > { %471 = dma.hbm_to_vmem [thread:$0]  (!%p469_p10), %s154_s23, 256, %s156_s26, [#allocation4], %s687_s27, %s687_s27, %s688_s28  }
  0x14   : > { %p782_p0 = por %p92_p13, %p91_p12  ;;  %p788_p3 = por %p745_p2, %p91_p12 }
  0x15   : > { %s77_s5 = ssub.s32 %s680_s13, %s889_s29  ;;  %p481_p5 = scmp.lt.s32.totalorder %s684_s14, 3 }
  0x16   : > { %p82_p7 = scmp.eq.s32.totalorder %s77_s5, 0  ;;  %s169_s6 = sand.u32 1, %s672_s11  }
  0x17   : > { %s436_s7 = sshll.u32 %s169_s6, 5  ;;  %s452_s15 = sshll.u32 %s680_s13, 5 }
  0x18   : > { %s797_s8 = scalar_select %p82_p7, %s672_s11, %s84_s30  }
  0x19   : > { %s181_s22 = scalar_lea.hbm %s874_s1, %s452_s15  ;;  %s173_s23 = scalar_lea.vmem [#allocation6], %s436_s7 }
  0x1a   : > { %s184_s25 = sshll.u32 %s173_s23, 4  ;;  %s182_s18 = sshll.u32 %s181_s22, 4  ;;  %s185_s25 = int_to_ptr.vmem [resolvable:$true] %s184_s25  ;;  %s183_s18 = int_to_ptr.hbm [resolvable:$true] %s182_s18 }
  0x1b   : > { %p473_p2 = pnand %p481_p5, %p782_p0  ;;  %s170_s26 = scalar_lea.sflag [#allocation7], %s169_s6 }
  0x1c   : > { %196 = sbr.rel (%p764_p8) target bundleno = 210 (0xd2), region = 28 }
  0x1d   : > { %475 = dma.hbm_to_vmem [thread:$0]  (!%p473_p2), %s183_s18, 512, %s185_s25, %s170_s26, %s687_s27, %s687_s27, %s688_s28  }
  0x21   : > { %651 = dma.done.wait (%p741_p1), [#allocation4], 256  }
  0x22   : > { %653 = vsyncadd (%p741_p1), [#allocation4], 4294967040  ;;  %s815_s30 = sand.u32 1, %s668_s10  }
  0x23   : > { %s441_s3 = sshll.u32 %s815_s30, 5  ;;  %s204_s5 = scalar_lea.sflag [#allocation7], %s815_s30 }
  0x24   : > { %s207_s6 = scalar_lea.vmem [#allocation6], %s441_s3 }
  0x25   : > { %655 = dma.done.wait (%p751_p4), %s204_s5, 512  }
  0x26   : > { %657 = vsyncadd (%p751_p4), %s204_s5, 4294966784  ;;  %s442_s24 = sshll.u32 %s815_s30, 4  ;;  %vm236_vm0 = vcmask 261120   ;;  %v689_v0 = vmov 0.0   ;;  %v246_v1 = vld [vmem:[%s207_s6 + $0x18] sm:$0xff]  ;;  %v245_v2 = vld [vmem:[%s207_s6 + $0x10] sm:$0xff] }
  0x27   : > { %237 = vst.msk [vmem:[#allocation2] sm:$0xff] %vm236_vm0, %v689_v0  ;;  %266 = vmatpush.msra.mxu0 %v246_v1  ;;  %456 = vmatpush.msra.mxu1 %v246_v1  ;;  %v244_v3 = vld [vmem:[%s207_s6 + $0x8] sm:$0xff]  ;;  %v243_v4 = vld [vmem:[%s207_s6] sm:$0xff]  ;;  %v241_v5 = vld [vmem:[#allocation3] sm:$0xff]  ;;  %p281_p1 = scmp.eq.s32.totalorder %s676_s12, 0  ;;  %s228_s17 = scalar_lea.vmem [#allocation8], %s442_s24 }
  0x28   : > { %238 = vst.msk [vmem:[#allocation2 + $0x8] sm:$0xff] %vm236_vm0, %v689_v0  ;;  %v242_v6 = vld [vmem:[#allocation3 + $0x8] sm:$0xff] }
  0x29   : > { %267 = vmatpush.msra.mxu0 %v245_v2  ;;  %457 = vmatpush.msra.mxu1 %v245_v2 }
  0x2b   : > { %268 = vmatpush.msra.mxu0 %v244_v3  ;;  %458 = vmatpush.msra.mxu1 %v244_v3 }
  0x2d   : > { %269 = vmatpush.msra.mxu0 %v243_v4  ;;  %459 = vmatpush.msra.mxu1 %v243_v4 }
  0x2e   : > { %443 = vmatmul.msk.f32.vlgmr.msra.gmra.mxu0 %vm236_vm0, %v241_v5  ;;  %444 = vmatmul.msk.f32.vlgmr.msra.gmra.mxu1 %vm236_vm0, %v242_v6  ;;  %v239_v7 = vld [vmem:[#allocation2] sm:$0xff] }
  0x2f   : > { %v240_v8 = vld [vmem:[#allocation2 + $0x8] sm:$0xff] }
  0xab   : > { %v271_v9 = vpop.f32.mrf.mxu0  ;;  %v274_v10 = vpop.f32.mrf.mxu1  ;;  %285 = sbr.rel (!%p281_p1) target bundleno = 186 (0xba), region = 44 }
  0xac   : > { %v277_v11 = vadd.f32 %v271_v9, %v239_v7  ;;  %v278_v12 = vadd.f32 %v274_v10, %v240_v8 }
  0xae   : > { %279 = vst.msk [vmem:[#allocation2] sm:$0xff] %vm236_vm0, %v277_v11 }
  0xaf   : > { %280 = vst.msk [vmem:[#allocation2 + $0x8] sm:$0xff] %vm236_vm0, %v278_v12 }
  0xb5   : > { %v286_v13 = vld [vmem:[#allocation2] sm:$0xff] }
  0xb6   : > { %v287_v14 = vld [vmem:[#allocation2 + $0x8] sm:$0xff]  ;;  %v288_v15 = vmul.f32 0.35355338, %v286_v13 }
  0xb7   : > { %v289_v16 = vmul.f32 0.35355338, %v287_v14 }
  0xb8   : > { %290 = vst.msk [vmem:[%s228_s17] sm:$0xff] %vm236_vm0, %v288_v15 }
  0xb9   : > { %291 = vst.msk [vmem:[%s228_s17 + $0x8] sm:$0xff] %vm236_vm0, %v289_v16 }
  0xba PF: > { %p292_p4 = scmp.ne.s32.totalorder %s676_s12, 0 }
  0xbc   : > { %296 = sbr.rel (!%p292_p4) target bundleno = 194 (0xc2), region = 48 }
  0xbf   : > { %v297_v17 = vld [vmem:[#allocation2] sm:$0xff] (%p292_p4) }
  0xc0   : > { %v298_v18 = vld [vmem:[#allocation2 + $0x8] sm:$0xff] (%p292_p4)  ;;  %299 = vst.msk [vmem:[%s228_s17] sm:$0xff] (%p292_p4), %vm236_vm0, %v297_v17 }
  0xc1   : > { %300 = vst.msk [vmem:[%s228_s17 + $0x8] sm:$0xff] %vm236_vm0, %v298_v18 }
  0xc2 PF: > { %s455_s19 = sshll.u32 %s676_s12, 4  ;;  %s317_s15 = sshll.u32 %s228_s17, 4  ;;  %s318_s15 = int_to_ptr.vmem [resolvable:$true] %s317_s15 }
  0xc3   : > { %s316_s7 = scalar_lea.hbm %s875_s2, %s455_s19  ;;  %s302_s21 = scalar_lea.sflag [#allocation5], %s815_s30 }
  0xc4   : > { %s319_s16 = sshll.u32 %s316_s7, 4  ;;  %s618_s12 = scalar_lea.hbm %s875_s2, 48  ;;  %s320_s16 = int_to_ptr.hbm [resolvable:$true] %s319_s16 }
  0xc5   : > { %s612_s22 = sshra.s32 %s320_s16, 4  ;;  %s613_s22 = int_to_ptr.hbm [resolvable:$true] %s612_s22 }
  0xc6   : > { %s614_s23 = scalar_lea.hbm %s613_s22, 16  ;;  %p619_p11 = scmp.lt.s32.totalorder %s613_s22, %s875_s2 }
  0xc7   : > { %p615_p8 = scmp.ne.s32.totalorder %s613_s22, %s614_s23  ;;  %p620_p12 = scmp.lt.s32.totalorder %s618_s12, %s614_s23 }
  0xc9   : > { %p616_p9 = pnand %p615_p8, %p788_p3  ;;  %p621_p13 = por %p620_p12, %p619_p11 }
  0xcb   : > { %p617_p10 = pneg %p616_p9 }
  0xcd   : > { %p622_p0 = pnand %p621_p13, %p617_p10 }
  0xcf   : > { %625 = shalt.err (!%p622_p0)
}
  0xd0   : > { %s690_s30 = smov 128   ;;  %s691_s5 = smov 8  }
  0xd1   : > { %466 = dma.vmem_to_hbm [thread:$0]  (%p788_p3), %s318_s15, 256, %s320_s16, %s302_s21, %s690_s30, %s690_s30, %s691_s5  }
  0xd2 PF: > { %p483_p5 = scmp.ge.s32.totalorder %s684_s14, 2  ;;  %s334_s6 = sand.u32 1, %s664_s9  }
  0xd3   : > { %s335_s24 = scalar_lea.sflag [#allocation5], %s334_s6 }
  0xd4   : > { %p477_p7 = pnand %p483_p5, %p756_p6 }
  0xd6   : > { %p478_p2 = pneg %p477_p7 }
  0xd8   : > { %659 = dma.done.wait (%p478_p2), %s335_s24, 256  }
  0xd9   : > { %661 = vsyncadd (%p478_p2), %s335_s24, 4294967040  ;;  %s19_s14 = sadd.s32 1, %s684_s14   ;;  %s883_s9 = smov %s668_s10 }
  0xda   : > { %p16_p1 = scmp.ge.s32.totalorder %s19_s14, 5   ;;  %s884_s10 = smov %s672_s11 }
  0xdb   : > { %s885_s11 = smov %s797_s8  ;;  %s886_s12 = smov %s680_s13 }
  0xdc   : > { %s887_s13 = smov %s889_s29  ;;  %18 = sbr.rel (!%p16_p1) target bundleno = 7 (0x7), region = 91 }
  0xe1   :  { %341 = vsyncpa [#allocation4], 1 }
  0xe2   :  { %343 = vsyncpa [#allocation4 + $0x1], 1 }
  0xe3   :  { %344 = vsyncpa [#allocation7], 1 }
  0xe4   :  { %346 = vsyncpa [#allocation7 + $0x1], 1 }
  0xe5   :  { %347 = vsyncpa [#allocation5], 1 }
  0xe6   :  { %349 = vsyncpa [#allocation5 + $0x1], 1 }

</bundles_post_ra>
